<compile_context>
chip_gen: v7x
topology: tpu7x:2x2x1
jax: 0.10.0
libtpu: 0.0.40
codegen_flags: <defaults>
</compile_context>

<pallas_src>
import warnings

import jax
import jax.numpy as jnp
from jax import lax
from jax.experimental import pallas as pl
from jax.experimental.pallas import tpu as pltpu

LANE = 128
SUB = 8
# Double-buffered streamed-input VMEM budget per pallas_call (all streamed
# inputs, both pipeline buffers) + headroom for the tiny partial outputs and
# Mosaic internal scratch.
STREAM_VMEM_BUDGET = 24 * 1024 * 1024
VMEM_HEADROOM = 8 * 1024 * 1024

_HAS_ONCHIP_PRNG = hasattr(pltpu, "prng_seed") and hasattr(pltpu, "stateful_normal")


def _round_up(x, m):
    return ((x + m - 1) // m) * m


def _cdiv(a, b):
    return -(-a // b)


def _sublane_partial(x, block_rows):
    # (R,128) -> (R//8, 8, 128): each group is exactly one f32 vreg tile, so
    # the reduce is vreg-wise VPU adds (no cross-lane XLU) and the (8,128)
    # partial keeps f32 accuracy.
    return jnp.sum(x.reshape(block_rows // SUB, SUB, LANE), axis=0)


def _valid_row_mask(block_rows, total_rows):
    # Rows past `total_rows` in the (ragged) last block are unspecified data;
    # a select (never a multiply) keeps any garbage/NaN out of the sums.
    limit = total_rows - pl.program_id(0) * block_rows
    return lax.broadcasted_iota(jnp.int32, (block_rows, LANE), 0) < limit


# ---------------------------------------------------------------------------
# Pass 1: per-block partial sums of |sr - hr|  ->  (unscaled) sigma mean
# ---------------------------------------------------------------------------
def _make_sigma_kernel(block_rows, total_rows):
    need_mask = (total_rows % block_rows) != 0

    def kernel(sr_ref, hr_ref, part_ref):
        d = sr_ref[...].astype(jnp.float32) - hr_ref[...].astype(jnp.float32)
        a = jnp.abs(d)
        if need_mask:
            a = jnp.where(_valid_row_mask(block_rows, total_rows), a, 0.0)
        part_ref[...] = _sublane_partial(a, block_rows)

    return kernel


# ---------------------------------------------------------------------------
# Pass 2: per-block partial sums of |d + thresholded_|d| * z|
# ---------------------------------------------------------------------------
def _make_loss_prng_kernel(block_rows, total_rows):
    need_mask = (total_rows % block_rows) != 0

    def kernel(seed_ref, thr_ref, sr_ref, hr_ref, part_ref):
        i = pl.program_id(0)
        # Distinct deterministic seed per grid block: decorrelates noise
        # between blocks and is independent of which TensorCore runs it.
        pltpu.prng_seed(seed_ref[0] + i * jnp.int32(1000003))
        d = sr_ref[...].astype(jnp.float32) - hr_ref[...].astype(jnp.float32)
        ad = jnp.abs(d)
        s = jnp.where(ad < thr_ref[0, 0], 0.0, ad)
        # (On v7x a bf16 normal would halve the EUP cost of Box-Muller; kept
        # f32 here for maximum lowering compatibility.)
        z = pltpu.stateful_normal(d.shape, jnp.float32)
        resid = jnp.abs(d + s * z)
        if need_mask:
            resid = jnp.where(_valid_row_mask(block_rows, total_rows), resid, 0.0)
        part_ref[...] = _sublane_partial(resid, block_rows)

    return kernel


def _make_loss_extz_kernel(block_rows, total_rows):
    need_mask = (total_rows % block_rows) != 0

    def kernel(thr_ref, sr_ref, hr_ref, z_ref, part_ref):
        d = sr_ref[...].astype(jnp.float32) - hr_ref[...].astype(jnp.float32)
        ad = jnp.abs(d)
        s = jnp.where(ad < thr_ref[0, 0], 0.0, ad)
        resid = jnp.abs(d + s * z_ref[...].astype(jnp.float32))
        if need_mask:
            resid = jnp.where(_valid_row_mask(block_rows, total_rows), resid, 0.0)
        part_ref[...] = _sublane_partial(resid, block_rows)

    return kernel


# ---------------------------------------------------------------------------
# Wrapper helpers
# ---------------------------------------------------------------------------
def _choose_block_rows(rows, streamed_itemsizes):
    # 16-row alignment when any streamed input is sub-32-bit (bf16 packs two
    # rows per sublane) to avoid packed-sublane relayout; 8 otherwise.
    align = SUB if min(streamed_itemsizes) >= 4 else 2 * SUB
    bytes_per_row = LANE * int(sum(streamed_itemsizes))
    target = max(align, (STREAM_VMEM_BUDGET // (2 * bytes_per_row)) // align * align)
    # At least two grid blocks whenever the input allows it so v7x's two
    # TensorCores both get work under the "parallel" grid axis.
    split = _round_up(_cdiv(rows, 2), align)
    if split > rows:                      # very small inputs (rows >= 8 always)
        split = _round_up(_cdiv(rows, 2), SUB)
    return max(SUB, min(target, split))


def _streaming_specs(block_rows, num_blocks):
    tile = pl.BlockSpec((block_rows, LANE), lambda i: (i, 0))
    part = pl.BlockSpec((SUB, LANE), lambda i: (i, 0))
    out_shape = jax.ShapeDtypeStruct((num_blocks * SUB, LANE), jnp.float32)
    return tile, part, out_shape


def _compiler_params(block_rows, streamed_itemsizes):
    streamed = 2 * block_rows * LANE * int(sum(streamed_itemsizes))  # 2 pipeline bufs
    vmem_limit = max(16 * 1024 * 1024, streamed + VMEM_HEADROOM)
    return pltpu.CompilerParams(
        dimension_semantics=("parallel",),
        vmem_limit_bytes=int(vmem_limit),
    )


# ---------------------------------------------------------------------------
# Public wrapper
# ---------------------------------------------------------------------------
def posteriorx255_loss(sr, hr, coef, seed=0, z=None):
    """Pallas implementation of Posteriorx255_loss.forward.

    sr, hr : float tensors of identical shape (e.g. NCHW), any float dtype.
    coef   : scalar weight.
    seed   : int seed for the in-kernel Gaussian noise (deterministic stand-in
             for torch.randn_like's global RNG stream).
    z      : optional explicit noise tensor (same shape as sr); if given it is
             streamed through the kernel instead of the on-chip PRNG (useful
             for exact testing against a reference).
    """
    assert sr.shape == hr.shape
    n = int(sr.size)
    assert n > 0
    n_f = jnp.float32(n)

    rows = max(_cdiv(n, LANE), SUB)       # at least one full (8,128) tile
    padded_len = rows * LANE

    def prep(x):
        flat = x.reshape(-1)
        if padded_len != n:
            # Only when n is not a multiple of 128 (or < 1024 elements): a
            # small zero pad to the next lane multiple.  Padded zeros
            # contribute exactly 0 to both sums; the means divide by true n.
            flat = jnp.pad(flat, (0, padded_len - n))
        return flat.reshape(rows, LANE)

    sr2 = prep(sr)
    hr2 = prep(hr)
    isz_sr = jnp.dtype(sr2.dtype).itemsize
    isz_hr = jnp.dtype(hr2.dtype).itemsize

    smem_spec = pl.BlockSpec(memory_space=pltpu.MemorySpace.SMEM)

    # ---- pass 1: sum(|sr - hr|) -> unscaled sigma-mean threshold -----------
    br1 = _choose_block_rows(rows, (isz_sr, isz_hr))
    nb1 = _cdiv(rows, br1)
    tile1, part1, oshape1 = _streaming_specs(br1, nb1)
    sigma_parts = pl.pallas_call(
        _make_sigma_kernel(br1, rows),
        out_shape=oshape1,
        grid_spec=pltpu.PrefetchScalarGridSpec(
            num_scalar_prefetch=0,
            grid=(nb1,),
            in_specs=[tile1, tile1],
            out_specs=part1,
        ),
        compiler_params=_compiler_params(br1, (isz_sr, isz_hr)),
        cost_estimate=pl.CostEstimate(
            flops=4 * padded_len,
            transcendentals=0,
            bytes_accessed=padded_len * (isz_sr + isz_hr) + nb1 * SUB * LANE * 4,
        ),
    )(sr2, hr2)
    thr = (jnp.sum(sigma_parts) / n_f).reshape(1, 1)

    # ---- pass 2: sum(|d + thresholded_|d| * z|) -----------------------------
    loss_parts = None
    if z is None and _HAS_ONCHIP_PRNG:
        br2 = _choose_block_rows(rows, (isz_sr, isz_hr))
        nb2 = _cdiv(rows, br2)
        tile2, part2, oshape2 = _streaming_specs(br2, nb2)
        seed_arr = jnp.asarray([seed], dtype=jnp.int32)
        try:
            loss_parts = pl.pallas_call(
                _make_loss_prng_kernel(br2, rows),
                out_shape=oshape2,
                grid_spec=pltpu.PrefetchScalarGridSpec(
                    num_scalar_prefetch=0,
                    grid=(nb2,),
                    in_specs=[smem_spec, smem_spec, tile2, tile2],
                    out_specs=part2,
                ),
                compiler_params=_compiler_params(br2, (isz_sr, isz_hr)),
                cost_estimate=pl.CostEstimate(
                    flops=10 * padded_len,
                    transcendentals=2 * padded_len,
                    bytes_accessed=padded_len * (isz_sr + isz_hr)
                    + nb2 * SUB * LANE * 4,
                ),
            )(seed_arr, thr, sr2, hr2)
        except Exception as err:  # observable fallback, never silent
            warnings.warn(
                "Posteriorx255 on-chip PRNG kernel failed to lower/run "
                f"({err!r}); falling back to a streamed JAX-generated noise "
                "tensor (slower path, different random stream)."
            )
            loss_parts = None

    if loss_parts is None:
        if z is None:
            # bf16 noise halves the extra streamed bytes; the kernel upcasts.
            z2 = jax.random.normal(
                jax.random.PRNGKey(seed), (rows, LANE), dtype=jnp.bfloat16)
        else:
            z2 = prep(z)
        isz_z = jnp.dtype(z2.dtype).itemsize
        br3 = _choose_block_rows(rows, (isz_sr, isz_hr, isz_z))
        nb3 = _cdiv(rows, br3)
        tile3, part3, oshape3 = _streaming_specs(br3, nb3)
        loss_parts = pl.pallas_call(
            _make_loss_extz_kernel(br3, rows),
            out_shape=oshape3,
            grid_spec=pltpu.PrefetchScalarGridSpec(
                num_scalar_prefetch=0,
                grid=(nb3,),
                in_specs=[smem_spec, tile3, tile3, tile3],
                out_specs=part3,
            ),
            compiler_params=_compiler_params(br3, (isz_sr, isz_hr, isz_z)),
            cost_estimate=pl.CostEstimate(
                flops=8 * padded_len,
                transcendentals=0,
                bytes_accessed=padded_len * (isz_sr + isz_hr + isz_z)
                + nb3 * SUB * LANE * 4,
            ),
        )(thr, sr2, hr2, z2)

    posterior_loss = jnp.float32(255.0) * (jnp.sum(loss_parts) / n_f)
    # TODO(synk): loss_logger.cache_in('Train/Loss/Posteriorx255', ...) is
    # host-side logging with no Pallas equivalent; omitted.
    return jnp.asarray(coef, jnp.float32) * posterior_loss


def _reference(sr, hr, coef, z):
    sr = sr.astype(jnp.float32) * 255.0
    hr = hr.astype(jnp.float32) * 255.0
    sigma = jnp.abs(sr - hr)
    sigma = jnp.where(sigma < sigma.mean(), 0.0, sigma)
    return jnp.float32(coef) * jnp.mean(
        jnp.abs(hr - (sr + sigma * z.astype(jnp.float32))))


if __name__ == "__main__":
    key = jax.random.PRNGKey(0)
    k_sr, k_hr, k_z, k_sr2, k_hr2, k_z2 = jax.random.split(key, 6)
    coef = 0.5

    # 1) Exact check (evenly tiled): stream an explicit z through the kernel
    #    and compare with the plain-JAX reference using the same noise.
    shape = (2, 4, 16, 16)           # NCHW, values ~[0,1]
    sr = 0.5 + 0.1 * jax.random.normal(k_sr, shape, dtype=jnp.float32)
    hr = sr + 0.05 * jax.random.normal(k_hr, shape, dtype=jnp.float32)
    z = jax.random.normal(k_z, shape, dtype=jnp.float32)
    out_ext = jax.block_until_ready(posteriorx255_loss(sr, hr, coef, z=z))
    ref = jax.block_until_ready(_reference(sr, hr, coef, z))
    assert jnp.allclose(out_ext, ref, rtol=1e-4, atol=1e-3), (out_ext, ref)

    # 2) Exact check on a ragged row count (exercises the in-kernel tail mask:
    #    10 rows of 128 lanes with 8-row blocks -> last block is partial).
    shape_r = (1, 1, 10, 128)
    sr_r = 0.5 + 0.1 * jax.random.normal(k_sr2, shape_r, dtype=jnp.float32)
    hr_r = sr_r + 0.05 * jax.random.normal(k_hr2, shape_r, dtype=jnp.float32)
    z_r = jax.random.normal(k_z2, shape_r, dtype=jnp.float32)
    out_r = jax.block_until_ready(posteriorx255_loss(sr_r, hr_r, coef, z=z_r))
    ref_r = jax.block_until_ready(_reference(sr_r, hr_r, coef, z_r))
    assert jnp.allclose(out_r, ref_r, rtol=1e-4, atol=1e-3), (out_r, ref_r)

    # 3) Default fast path: noise generated on-chip; check it runs, is
    #    finite/positive and deterministic for a fixed seed.
    out1 = jax.block_until_ready(posteriorx255_loss(sr, hr, coef, seed=123))
    out2 = jax.block_until_ready(posteriorx255_loss(sr, hr, coef, seed=123))
    assert bool(jnp.isfinite(out1)) and float(out1) > 0.0, out1
    assert jnp.allclose(out1, out2), (out1, out2)

    print("KERNEL_OK")
</pallas_src>

<mosaic_0001>
module attributes {stable_mosaic.version = 11 : i64} {
  func.func @kernel(%arg0: i32, %arg1: memref<8x128xf32, #tpu.memory_space<vmem>>, %arg2: memref<8x128xf32, #tpu.memory_space<vmem>>, %arg3: memref<8x128xf32, #tpu.memory_space<vmem>>) attributes {dimension_semantics = [#tpu.dimension_semantics<parallel>], iteration_bounds = array<i64: 2>, scalar_prefetch = 0 : i64, scratch_operands = 0 : i64, tpu.core_type = #tpu.core_type<tc>, window_params = [{transform_indices = @transform_0, window_bounds = array<i64: 8, 128>}, {transform_indices = @transform_1, window_bounds = array<i64: 8, 128>}, {transform_indices = @transform_2, window_bounds = array<i64: 8, 128>}]} {
    %c0 = arith.constant 0 : index
    %c0_0 = arith.constant 0 : index
    %0 = vector.load %arg1[%c0, %c0_0] : memref<8x128xf32, #tpu.memory_space<vmem>>, vector<8x128xf32>
    %c0_1 = arith.constant 0 : index
    %c0_2 = arith.constant 0 : index
    %1 = vector.load %arg2[%c0_1, %c0_2] : memref<8x128xf32, #tpu.memory_space<vmem>>, vector<8x128xf32>
    %2 = arith.subf %0, %1 : vector<8x128xf32>
    %3 = math.absf %2 : vector<8x128xf32>
    %4 = vector.shape_cast %3 : vector<8x128xf32> to vector<1x8x128xf32>
    %cst = arith.constant dense<0.000000e+00> : vector<8x128xf32>
    %5 = vector.multi_reduction <add>, %4, %cst [0] : vector<1x8x128xf32> to vector<8x128xf32>
    %c0_3 = arith.constant 0 : index
    %c0_4 = arith.constant 0 : index
    %6 = vector.load %arg3[%c0_3, %c0_4] : memref<8x128xf32, #tpu.memory_space<vmem>>, vector<8x128xf32>
    tpu.vector_store %arg3[%c0_3, %c0_4], %5 {strides = array<i32>} : memref<8x128xf32, #tpu.memory_space<vmem>>, vector<8x128xf32>,
    return
  }
  func.func @transform_0(%arg0: i32) -> (i32, i32) {
    %c0_i32 = arith.constant 0 : i32
    %c0_i32_0 = arith.constant 0 : i32
    return %arg0, %c0_i32 : i32, i32
  }
  func.func @transform_1(%arg0: i32) -> (i32, i32) {
    %c0_i32 = arith.constant 0 : i32
    %c0_i32_0 = arith.constant 0 : i32
    return %arg0, %c0_i32 : i32, i32
  }
  func.func @transform_2(%arg0: i32) -> (i32, i32) {
    %c0_i32 = arith.constant 0 : i32
    %c0_i32_0 = arith.constant 0 : i32
    return %arg0, %c0_i32 : i32, i32
  }
}

</mosaic_0001>

<bundles_post_ra>
// kernel: tpu_custom_call.1
= control target key start
LH: loop header
LB: loop body
LE: loop exit
PB: predicated region body
PF: predicated region fallthrough
CT: control target
= control target key end

     0   :  { %7 = vsyncpa [#allocation3], 0  ;;  %s734_s0 = inlined_call_operand.hbm [shape: f32[16,128], index: 0, kind: input, shape index: {}]   ;;  %s735_s1 = inlined_call_operand.hbm [shape: f32[16,128], index: 1, kind: input, shape index: {}]   ;;  %s736_s2 = inlined_call_operand.hbm [shape: f32[16,128], index: 2, kind: output, shape index: {}]  }
   0x1   :  { %9 = vsyncpa [#allocation3 + $0x1], 0 }
   0x2   :  { %10 = vsyncpa [#allocation6], 0 }
   0x3   :  { %12 = vsyncpa [#allocation6 + $0x1], 0 }
   0x4   :  { %13 = vsyncpa [#allocation4], 0 }
   0x5   :  { %15 = vsyncpa [#allocation4 + $0x1], 0  ;;  %s525_s9 = smov 0   ;;  %s527_s10 = smov 0  }
   0x6   :  { %s529_s11 = smov 0   ;;  %s531_s12 = smov 0  }
   0x7 LB: > { %s546_s13 = sadd.s32 4294967295, %s505_s12   ;;  %s309_s14 = sadd.s32 4294967294, %s505_s12   ;;  %s505_s12 = sphi %s531_s12, %s755_s12   ;;  %s501_s11 = sphi %s529_s11, %s754_s11   ;;  %s497_s10 = sphi %s527_s10, %s753_s10   ;;  %s493_s9 = sphi %s525_s9, %s752_s9  }
   0x8   : > { %s550_s15 = sadd.s32 1, %s505_s12   ;;  %s28_s16 = sadd.s32 1, %s501_s11 }
   0x9   : > { %s25_s17 = ssub.s32 %s505_s12, %s550_s15  ;;  %p35_p0 = scmp.ne.s32.totalorder %s501_s11, %s497_s10 }
   0xa   : > { %p26_p1 = scmp.eq.s32.totalorder %s25_s17, 0  ;;  %p36_p2 = scmp.eq.s32.totalorder %s505_s12, 0 }
   0xb   : > { %p41_p3 = scmp.ne.s32.totalorder %s497_s10, %s493_s9  ;;  %p42_p4 = scmp.eq.s32.totalorder %s546_s13, 0 }
   0xc   : > { %s562_s18 = scalar_select %p26_p1, %s501_s11, %s28_s16  }
   0xd   : > { %p564_p5 = por %p36_p2, %p35_p0  ;;  %p568_p6 = por %p42_p4, %p41_p3 }
   0xe   : > { %p91_p7 = scmp.eq.s32.totalorder %s546_s13, 1  ;;  %p97_p8 = scmp.eq.s32.totalorder %s309_s14, 1 }
   0xf   : > { %s740_s20 = scalar_select %p568_p6, 1, 0 }
  0x10   : > { %p341_p10 = scmp.lt.s32.totalorder %s505_s12, 2  ;;  %p575_p11 = por %p91_p7, %p35_p0 }
  0x11   : > { %p579_p12 = por %p97_p8, %p41_p3  ;;  %s584_s23 = sand.u32 1, %s501_s11  }
  0x12   : > { %s741_s21 = scalar_select %p575_p11, 1, 0 }
  0x13   : > { %s742_s22 = scalar_select %p579_p12, 1, 0 }
  0x14   : > { %s313_s24 = sshll.u32 %s505_s12, 7  ;;  %s312_s25 = sshll.u32 %s584_s23, 3 }
  0x15   : > { %s593_s28 = scalar_lea.hbm %s734_s0, %s313_s24  ;;  %s121_s29 = scalar_lea.vmem [#allocation2], %s312_s25 }
  0x16   : > { %s128_s30 = sshll.u32 %s121_s29, 4  ;;  %p599_p13 = pnand %p341_p10, %p564_p5  ;;  %s603_s30 = int_to_ptr.vmem [resolvable:$true] %s128_s30 }
  0x17   : > { %s118_s4 = scalar_lea.sflag [#allocation3], %s584_s23  ;;  %s375_s5 = scalar_lea.hbm %s593_s28, 128 }
  0x18   : > { %p376_p2 = scmp.ne.s32.totalorder %s593_s28, %s375_s5  ;;  %p377_p3 = pneg %p599_p13 }
  0x19   : > { %s380_s8 = scalar_lea.hbm %s734_s0, 256  ;;  %p381_p5 = scmp.lt.u32.totalorder %s593_s28, %s734_s0 }
  0x1a   : > { %p378_p4 = pnand %p377_p3, %p376_p2  ;;  %p382_p8 = scmp.lt.u32.totalorder %s380_s8, %s375_s5 }
  0x1b   : > { %p384_p9 = scmp.lt.u32.totalorder %s375_s5, %s593_s28 }
  0x1c   : > { %p379_p7 = pneg %p378_p4  ;;  %p383_p10 = por %p382_p8, %p381_p5 }
  0x1e   : > { %p385_p0 = por %p384_p9, %p383_p10 }
  0x20   : > { %p386_p1 = pnand %p385_p0, %p379_p7 }
  0x22   : > { %389 = shalt.err (!%p386_p1)
}
  0x23   : > { %s390_s17 = scalar_lea.vmem %s603_s30, 128  ;;  %s507_s19 = smov [#allocation2]  }
  0x24   : > { %p391_p2 = scmp.ne.s32.totalorder %s603_s30, %s390_s17  ;;  %s395_s26 = sshll.u32 %s507_s19, 4  ;;  %s396_s26 = int_to_ptr.vmem [resolvable:$false] %s395_s26 }
  0x25   : > { %s397_s27 = scalar_lea.vmem %s396_s26, 256  ;;  %p398_p11 = scmp.lt.s32.totalorder %s603_s30, %s396_s26 }
  0x26   : > { %p393_p4 = pnand %p391_p2, %p377_p3  ;;  %p399_p5 = scmp.lt.s32.totalorder %s397_s27, %s390_s17 }
  0x28   : > { %p394_p12 = pneg %p393_p4  ;;  %p400_p8 = por %p399_p5, %p398_p11 }
  0x2a   : > { %p401_p9 = pnand %p400_p8, %p394_p12 }
  0x2c   : > { %404 = shalt.err (!%p401_p9)
}
  0x2d   : > { %333 = dma.hbm_to_vmem [thread:$0]  (!%p599_p13), %s593_s28, 128, %s603_s30, %s118_s4  }
  0x2e   : > { %p744_p0 = scmp.lt.s32.totalorder %s505_s12, 3  ;;  %p745_p1 = scmp.ge.s32.totalorder %s505_s12, 1 }
  0x2f   : > { %s646_s7 = scalar_lea.hbm %s735_s1, %s313_s24  ;;  %s139_s8 = scalar_lea.vmem [#allocation5], %s312_s25 }
  0x30   : > { %p637_p7 = pnand %p745_p1, %p744_p0  ;;  %s146_s14 = sshll.u32 %s139_s8, 4  ;;  %s147_s14 = int_to_ptr.vmem [resolvable:$true] %s146_s14 }
  0x31   : > { %s136_s28 = scalar_lea.sflag [#allocation6], %s584_s23  ;;  %s405_s30 = scalar_lea.hbm %s646_s7, 128 }
  0x32   : > { %s746_s29 = scalar_select %p637_p7, 1, 0 }
  0x33   : > { %p406_p11 = scmp.ne.s32.totalorder %s646_s7, %s405_s30  ;;  %s410_s24 = scalar_lea.hbm %s735_s1, 256 }
  0x34   : > { %p411_p2 = scmp.lt.u32.totalorder %s646_s7, %s735_s1  ;;  %p412_p4 = scmp.lt.u32.totalorder %s410_s24, %s405_s30 }
  0x35   : > { %p408_p12 = pnand %p406_p11, %p377_p3  ;;  %p414_p8 = scmp.lt.u32.totalorder %s405_s30, %s646_s7 }
  0x36   : > { %p413_p5 = por %p412_p4, %p411_p2 }
  0x37   : > { %p409_p10 = pneg %p408_p12 }
  0x38   : > { %p415_p9 = por %p414_p8, %p413_p5 }
  0x3a   : > { %p416_p0 = pnand %p415_p9, %p409_p10 }
  0x3c   : > { %419 = shalt.err (!%p416_p0)
}
  0x3d   : > { %s420_s23 = scalar_lea.vmem %s147_s14, 128  ;;  %s508_s25 = smov [#allocation5]  }
  0x3e   : > { %p421_p1 = scmp.ne.s32.totalorder %s147_s14, %s420_s23  ;;  %s425_s26 = sshll.u32 %s508_s25, 4  ;;  %s426_s26 = int_to_ptr.vmem [resolvable:$false] %s425_s26 }
  0x3f   : > { %s427_s27 = scalar_lea.vmem %s426_s26, 256  ;;  %p428_p6 = scmp.lt.s32.totalorder %s147_s14, %s426_s26 }
  0x40   : > { %p423_p11 = pnand %p421_p1, %p377_p3  ;;  %p429_p7 = scmp.lt.s32.totalorder %s427_s27, %s420_s23 }
  0x42   : > { %p424_p12 = pneg %p423_p11  ;;  %p430_p2 = por %p429_p7, %p428_p6 }
  0x44   : > { %p431_p4 = pnand %p430_p2, %p424_p12 }
  0x46   : > { %434 = shalt.err (!%p431_p4)
}
  0x47   : > { %336 = dma.hbm_to_vmem [thread:$0]  (!%p599_p13), %s646_s7, 128, %s147_s14, %s136_s28  }
  0x48   : > { %p747_p10 = scmp.ne.s32.totalorder %s746_s29, 0 }
  0x49   : > { %s673_s5 = sand.u32 (!%p747_p10), 1, %s497_s10   ;;  %p748_p3 = scmp.ne.s32.totalorder (!%p747_p10), %s740_s20, 0 }
  0x4a   : > { %155 = sbr.rel (%p747_p10) target bundleno = 110 (0x6e), region = 28  ;;  %s317_s6 = sshll.u32 (!%p747_p10), %s673_s5, 3 }
  0x4b   : > { %s158_s8 = scalar_lea.sflag (!%p747_p10), [#allocation3], %s673_s5  ;;  %s161_s30 = scalar_lea.vmem (!%p747_p10), [#allocation2], %s317_s6 }
  0x51   : > { %480 = dma.done.wait (%p748_p3), %s158_s8, 128  }
  0x52   : > { %482 = vsyncadd (%p748_p3), %s158_s8, 4294967168  ;;  %s167_s3 = scalar_lea.sflag [#allocation6], %s673_s5  ;;  %s170_s7 = scalar_lea.vmem [#allocation5], %s317_s6 }
  0x53   : > { %484 = dma.done.wait (%p748_p3), %s167_s3, 128  }
  0x54   : > { %486 = vsyncadd (%p748_p3), %s167_s3, 4294967168  ;;  %v196_v0 = vld [vmem:[%s161_s30] sm:$0xff]  ;;  %v197_v1 = vld [vmem:[%s170_s7] sm:$0xff]  ;;  %s195_s29 = scalar_lea.vmem [#allocation7], %s317_s6  ;;  %s321_s28 = sshll.u32 %s546_s13, 7 }
  0x55   : > { %s216_s14 = sshll.u32 %s195_s29, 4  ;;  %v198_v2 = vsub.f32 %v196_v0, %v197_v1  ;;  %s692_s20 = scalar_lea.hbm %s736_s2, %s321_s28  ;;  %s687_s14 = int_to_ptr.vmem [resolvable:$true] %s216_s14 }
  0x56   : > { %s203_s24 = scalar_lea.sflag [#allocation4], %s673_s5  ;;  %s435_s17 = scalar_lea.vmem %s687_s14, 128 }
  0x57   : > { %v199_v3 = vand.u32 2147483647, %v198_v2  ;;  %p436_p6 = scmp.ne.s32.totalorder %s687_s14, %s435_s17  ;;  %p749_p13 = scmp.ne.s32.totalorder %s741_s21, 0 }
  0x58   : > { %s509_s13 = smov [#allocation7]  }
  0x59   : > { %201 = vst [vmem:[%s195_s29] sm:$0xff] %v199_v3  ;;  %p437_p7 = pnand %p436_p6, %p749_p13  ;;  %s439_s19 = sshll.u32 %s509_s13, 4  ;;  %s440_s19 = int_to_ptr.vmem [resolvable:$false] %s439_s19 }
  0x5a   : > { %s441_s23 = scalar_lea.vmem %s440_s19, 256  ;;  %p442_p8 = scmp.lt.s32.totalorder %s687_s14, %s440_s19 }
  0x5b   : > { %p438_p5 = pneg %p437_p7  ;;  %p443_p9 = scmp.lt.s32.totalorder %s441_s23, %s435_s17 }
  0x5d   : > { %p444_p0 = por %p443_p9, %p442_p8 }
  0x5f   : > { %p445_p1 = pnand %p444_p0, %p438_p5 }
  0x61   : > { %448 = shalt.err (!%p445_p1)
}
  0x62   : > { %s449_s25 = scalar_lea.hbm %s692_s20, 128  ;;  %s453_s5 = scalar_lea.hbm %s736_s2, 256 }
  0x63   : > { %p450_p11 = scmp.ne.s32.totalorder %s692_s20, %s449_s25  ;;  %p454_p4 = scmp.lt.u32.totalorder %s692_s20, %s736_s2 }
  0x64   : > { %p455_p10 = scmp.lt.u32.totalorder %s453_s5, %s449_s25  ;;  %p457_p6 = scmp.lt.u32.totalorder %s449_s25, %s692_s20 }
  0x65   : > { %p451_p12 = pnand %p450_p11, %p749_p13 }
  0x66   : > { %p456_p3 = por %p455_p10, %p454_p4 }
  0x67   : > { %p452_p2 = pneg %p451_p12 }
  0x68   : > { %p458_p7 = por %p457_p6, %p456_p3 }
  0x6a   : > { %p459_p5 = pnand %p458_p7, %p452_p2 }
  0x6c   : > { %462 = shalt.err (!%p459_p5)
}
  0x6d   : > { %328 = dma.vmem_to_hbm [thread:$0]  (%p749_p13), %s687_s14, 128, %s692_s20, %s203_s24  }
  0x6e PF: > { %s228_s30 = sand.u32 1, %s493_s9   ;;  %p750_p8 = scmp.ne.s32.totalorder %s742_s22, 0 }
  0x6f   : > { %p751_p9 = scmp.ge.s32.totalorder %s505_s12, 2  ;;  %s229_s3 = scalar_lea.sflag [#allocation4], %s228_s30 }
  0x71   : > { %p338_p0 = pnand %p751_p9, %p750_p8 }
  0x73   : > { %488 = dma.done.wait (!%p338_p0), %s229_s3, 128  }
  0x74   : > { %490 = vsyncadd (!%p338_p0), %s229_s3, 4294967168  ;;  %p18_p1 = scmp.ge.s32.totalorder %s550_s15, 4   ;;  %s752_s9 = smov %s497_s10 }
  0x75   : > { %s753_s10 = smov %s501_s11  ;;  %s754_s11 = smov %s562_s18 }
  0x76   : > { %s755_s12 = smov %s550_s15  ;;  %20 = sbr.rel (!%p18_p1) target bundleno = 7 (0x7), region = 86 }
  0x7d   :  { %234 = vsyncpa [#allocation3], 1 }
  0x7e   :  { %236 = vsyncpa [#allocation3 + $0x1], 1 }
  0x7f   :  { %237 = vsyncpa [#allocation6], 1 }
  0x80   :  { %239 = vsyncpa [#allocation6 + $0x1], 1 }
  0x81   :  { %240 = vsyncpa [#allocation4], 1 }
  0x82   :  { %242 = vsyncpa [#allocation4 + $0x1], 1 }

</bundles_post_ra>
